<compile_context>
chip_gen: v5e
topology: v5e:2x2
jax: 0.10.0
libtpu: 0.0.40
codegen_flags: <defaults>
</compile_context>

<pallas_src>
import functools

import jax
import jax.numpy as jnp
from jax.experimental import pallas as pl
from jax.experimental.pallas import tpu as pltpu

LANES = 128  # pad all feature dims (and the node dim) to full lane width


def _round_up(x, m):
    return (x + m - 1) // m * m


# ---------------------------------------------------------------------------
# Fused 3-layer GraphSAGE kernel
# ---------------------------------------------------------------------------
def graphsage_fused_kernel(a_ref, x_ref,
                           ws1_ref, wn1_ref, b1_ref, s1_ref, t1_ref,
                           ws2_ref, wn2_ref, b2_ref,
                           ws3_ref, wn3_ref, b3_ref,
                           out_ref):
    a = a_ref[...]                        # (Np, Np) bf16, row-normalized, zero-padded

    def sage(h_bf16, ws_ref, wn_ref, b_ref):
        # Self-path GEMM: independent of A@h, so its MXU pushes can be
        # scheduled while the aggregation result is still popping.
        self_t = jnp.dot(h_bf16, ws_ref[...],
                         preferred_element_type=jnp.float32)
        # Mean neighbor aggregation on the MXU (bf16 in, f32 accumulate).
        agg = jnp.dot(a, h_bf16, preferred_element_type=jnp.float32)
        neigh_t = jnp.dot(agg.astype(jnp.bfloat16), wn_ref[...],
                          preferred_element_type=jnp.float32)
        return self_t + neigh_t + b_ref[...]

    # ---- layer 1: SAGEConv -> ReLU -> (dropout = identity) -> BatchNorm ----
    h1 = jnp.maximum(sage(x_ref[...], ws1_ref, wn1_ref, b1_ref), 0.0)
    h1 = h1 * s1_ref[...] + t1_ref[...]   # folded eval-mode BN (one FMA)
    # ---- layer 2: SAGEConv -> ReLU -> (dropout = identity) ----
    h2 = jnp.maximum(sage(h1.astype(jnp.bfloat16), ws2_ref, wn2_ref, b2_ref), 0.0)
    # ---- layer 3: SAGEConv (logits) ----
    out_ref[...] = sage(h2.astype(jnp.bfloat16), ws3_ref, wn3_ref, b3_ref)


def model_forward(a_pad_bf16, x_pad_bf16, fused, *, num_nodes, num_classes):
    """Single fused pallas_call for the whole 3-layer forward pass."""
    n_pad = a_pad_bf16.shape[0]
    args = (a_pad_bf16, x_pad_bf16,
            fused["ws1"], fused["wn1"], fused["b1"], fused["s1"], fused["t1"],
            fused["ws2"], fused["wn2"], fused["b2"],
            fused["ws3"], fused["wn3"], fused["b3"])

    # Explicit VMEM budget: inputs + f32 output + generous headroom.
    footprint = sum(int(a.size) * a.dtype.itemsize for a in args)
    footprint += n_pad * LANES * 4
    vmem_budget = max(2 * footprint + (1 << 20), 4 << 20)

    vmem = pl.BlockSpec(memory_space=pltpu.MemorySpace.VMEM)  # whole array in VMEM
    out = pl.pallas_call(
        graphsage_fused_kernel,
        out_shape=jax.ShapeDtypeStruct((n_pad, LANES), jnp.float32),
        in_specs=[vmem] * len(args),
        out_specs=vmem,
        compiler_params=pltpu.CompilerParams(vmem_limit_bytes=vmem_budget),
    )(*args)
    return out[:num_nodes, :num_classes]  # strip node / lane padding


# ---------------------------------------------------------------------------
# Parameter preparation (done ONCE, outside the kernel)
# ---------------------------------------------------------------------------
def _pad1d(v, cols):
    return jnp.pad(v, (0, cols - v.shape[0]))


def _pad2d(w, rows, cols):
    r, c = w.shape
    return jnp.pad(w, ((0, rows - r), (0, cols - c)))


def fuse_params(params, in_feats, h_feats, num_classes):
    """Pad self/neighbor weights to 128x128, fold eval-mode BN into an affine."""
    fp = LANES

    def pad_w(w):
        return _pad2d(w, fp, fp).astype(jnp.bfloat16)

    # eval-mode BatchNorm folded into affine (padded cols get scale=shift=0)
    scale = params["bn_gamma"] * jax.lax.rsqrt(params["bn_var"] + 1e-5)
    shift = params["bn_beta"] - params["bn_mean"] * scale

    fused = dict(
        ws1=pad_w(params["w_self1"]), wn1=pad_w(params["w_neigh1"]),
        b1=_pad1d(params["b1"], fp).reshape(1, fp),
        s1=_pad1d(scale, fp).reshape(1, fp),
        t1=_pad1d(shift, fp).reshape(1, fp),
        ws2=pad_w(params["w_self2"]), wn2=pad_w(params["w_neigh2"]),
        b2=_pad1d(params["b2"], fp).reshape(1, fp),
        ws3=pad_w(params["w_self3"]), wn3=pad_w(params["w_neigh3"]),
        b3=_pad1d(params["b3"], fp).reshape(1, fp),
    )

    # Zero-padding invariant: padded feature lanes must stay zero through all
    # three layers. That requires the padded tails of the BN affine, biases and
    # weight rows/cols to be zero (e.g. padding bn_gamma with its default 1
    # would silently break it). Assert once here on concrete host values.
    assert bool(jnp.all(fused["s1"][0, h_feats:] == 0))
    assert bool(jnp.all(fused["t1"][0, h_feats:] == 0))
    assert bool(jnp.all(fused["b1"][0, h_feats:] == 0))
    assert bool(jnp.all(fused["b2"][0, h_feats:] == 0))
    assert bool(jnp.all(fused["b3"][0, num_classes:] == 0))
    assert bool(jnp.all(fused["ws1"][in_feats:, :] == 0))
    assert bool(jnp.all(fused["wn1"][in_feats:, :] == 0))
    assert bool(jnp.all(fused["ws3"][:, num_classes:] == 0))
    assert bool(jnp.all(fused["wn3"][:, num_classes:] == 0))
    return fused


def init_params(key, in_feats, h_feats, num_classes):
    ks = jax.random.split(key, 9)

    def lin(k, fi, fo):
        # stored as (in, out) so that x @ W matches PyTorch's x @ W.T
        return jax.random.normal(k, (fi, fo), jnp.float32) * 0.1

    return dict(
        w_self1=lin(ks[0], in_feats, h_feats),
        w_neigh1=lin(ks[1], in_feats, h_feats),
        b1=jax.random.normal(ks[2], (h_feats,), jnp.float32) * 0.01,
        w_self2=lin(ks[3], h_feats, h_feats),
        w_neigh2=lin(ks[4], h_feats, h_feats),
        b2=jax.random.normal(ks[5], (h_feats,), jnp.float32) * 0.01,
        w_self3=lin(ks[6], h_feats, num_classes),
        w_neigh3=lin(ks[7], h_feats, num_classes),
        b3=jax.random.normal(ks[8], (num_classes,), jnp.float32) * 0.01,
        # BatchNorm1d(h_feats) parameters / running stats (PyTorch defaults)
        bn_gamma=jnp.ones((h_feats,), jnp.float32),
        bn_beta=jnp.zeros((h_feats,), jnp.float32),
        bn_mean=jnp.zeros((h_feats,), jnp.float32),
        bn_var=jnp.ones((h_feats,), jnp.float32),
    )


def make_graph(key, n):
    """Deterministic random directed graph -> dense row-normalized adjacency."""
    adj = jax.random.bernoulli(key, 0.2, (n, n)).astype(jnp.float32)
    adj = adj * (1.0 - jnp.eye(n, dtype=jnp.float32))   # no self loops
    deg = jnp.sum(adj, axis=1, keepdims=True)
    return adj / jnp.maximum(deg, 1.0)                   # mean aggregation


if __name__ == "__main__":
    N = 64            # number of graph nodes
    IN_FEATS = 16
    H_FEATS = 32
    NUM_CLASSES = 8

    key = jax.random.PRNGKey(0)
    k_graph, k_feat, k_param = jax.random.split(key, 3)

    a_norm = make_graph(k_graph, N)
    x = jax.random.normal(k_feat, (N, IN_FEATS), jnp.float32)
    params = init_params(k_param, IN_FEATS, H_FEATS, NUM_CLASSES)

    # One-time parameter fusion / padding and input casts (outside the kernel).
    fused = fuse_params(params, IN_FEATS, H_FEATS, NUM_CLASSES)

    # Lane-align the node dimension: pad A to (Np, Np) and x to (Np, 128) with
    # zeros (Np = next multiple of 128) so the A@H contraction is a full lane
    # tile. Padded rows carry garbage but never propagate into real rows
    # because A's padded columns are zero.
    N_PAD = _round_up(N, LANES)
    a_pad = (jnp.zeros((N_PAD, N_PAD), jnp.float32)
             .at[:N, :N].set(a_norm).astype(jnp.bfloat16))
    x_pad = (jnp.zeros((N_PAD, LANES), jnp.float32)
             .at[:N, :IN_FEATS].set(x).astype(jnp.bfloat16))

    fwd = jax.jit(functools.partial(model_forward,
                                    num_nodes=N, num_classes=NUM_CLASSES))
    logits = fwd(a_pad, x_pad, fused)
    jax.block_until_ready(logits)

    assert logits.shape == (N, NUM_CLASSES)
    assert jnp.all(jnp.isfinite(logits))
    print("KERNEL_OK")
</pallas_src>

<mosaic_0001>
module attributes {stable_mosaic.version = 11 : i64} {
  func.func @graphsage_fused_kernel(%arg0: memref<128x128xbf16, #tpu.memory_space<vmem>>, %arg1: memref<128x128xbf16, #tpu.memory_space<vmem>>, %arg2: memref<128x128xbf16, #tpu.memory_space<vmem>>, %arg3: memref<128x128xbf16, #tpu.memory_space<vmem>>, %arg4: memref<1x128xf32, #tpu.memory_space<vmem>>, %arg5: memref<1x128xf32, #tpu.memory_space<vmem>>, %arg6: memref<1x128xf32, #tpu.memory_space<vmem>>, %arg7: memref<128x128xbf16, #tpu.memory_space<vmem>>, %arg8: memref<128x128xbf16, #tpu.memory_space<vmem>>, %arg9: memref<1x128xf32, #tpu.memory_space<vmem>>, %arg10: memref<128x128xbf16, #tpu.memory_space<vmem>>, %arg11: memref<128x128xbf16, #tpu.memory_space<vmem>>, %arg12: memref<1x128xf32, #tpu.memory_space<vmem>>, %arg13: memref<128x128xf32, #tpu.memory_space<vmem>>) attributes {dimension_semantics = [], scalar_prefetch = 0 : i64, scratch_operands = 0 : i64, tpu.core_type = #tpu.core_type<tc>} {
    %c0 = arith.constant 0 : index
    %c0_0 = arith.constant 0 : index
    %0 = vector.load %arg0[%c0, %c0_0] : memref<128x128xbf16, #tpu.memory_space<vmem>>, vector<128x128xbf16>
    %c0_1 = arith.constant 0 : index
    %c0_2 = arith.constant 0 : index
    %1 = vector.load %arg1[%c0_1, %c0_2] : memref<128x128xbf16, #tpu.memory_space<vmem>>, vector<128x128xbf16>
    %c0_3 = arith.constant 0 : index
    %c0_4 = arith.constant 0 : index
    %2 = vector.load %arg2[%c0_3, %c0_4] : memref<128x128xbf16, #tpu.memory_space<vmem>>, vector<128x128xbf16>
    %cst = arith.constant dense<0.000000e+00> : vector<128x128xf32>
    %3 = tpu.matmul %1, %2, %cst {dimension_numbers = #tpu.dot_dimension_numbers<[1], [0], [0], [1], [0, 0, 1, 1], [], []>} : vector<128x128xbf16>, vector<128x128xbf16>, vector<128x128xf32> -> vector<128x128xf32>
    %cst_5 = arith.constant dense<0.000000e+00> : vector<128x128xf32>
    %4 = tpu.matmul %0, %1, %cst_5 {dimension_numbers = #tpu.dot_dimension_numbers<[1], [0], [0], [1], [0, 0, 1, 1], [], []>} : vector<128x128xbf16>, vector<128x128xbf16>, vector<128x128xf32> -> vector<128x128xf32>
    %5 = arith.truncf %4 : vector<128x128xf32> to vector<128x128xbf16>
    %c0_6 = arith.constant 0 : index
    %c0_7 = arith.constant 0 : index
    %6 = vector.load %arg3[%c0_6, %c0_7] : memref<128x128xbf16, #tpu.memory_space<vmem>>, vector<128x128xbf16>
    %cst_8 = arith.constant dense<0.000000e+00> : vector<128x128xf32>
    %7 = tpu.matmul %5, %6, %cst_8 {dimension_numbers = #tpu.dot_dimension_numbers<[1], [0], [0], [1], [0, 0, 1, 1], [], []>} : vector<128x128xbf16>, vector<128x128xbf16>, vector<128x128xf32> -> vector<128x128xf32>
    %8 = arith.addf %3, %7 : vector<128x128xf32>
    %c0_9 = arith.constant 0 : index
    %c0_10 = arith.constant 0 : index
    %9 = vector.load %arg4[%c0_9, %c0_10] : memref<1x128xf32, #tpu.memory_space<vmem>>, vector<1x128xf32>
    %10 = vector.broadcast %9 : vector<1x128xf32> to vector<128x128xf32>
    %11 = arith.addf %8, %10 : vector<128x128xf32>
    %cst_11 = arith.constant 0.000000e+00 : f32
    %12 = vector.broadcast %cst_11 : f32 to vector<128x128xf32>
    %13 = arith.maximumf %11, %12 : vector<128x128xf32>
    %c0_12 = arith.constant 0 : index
    %c0_13 = arith.constant 0 : index
    %14 = vector.load %arg5[%c0_12, %c0_13] : memref<1x128xf32, #tpu.memory_space<vmem>>, vector<1x128xf32>
    %15 = vector.broadcast %14 : vector<1x128xf32> to vector<128x128xf32>
    %16 = arith.mulf %13, %15 : vector<128x128xf32>
    %c0_14 = arith.constant 0 : index
    %c0_15 = arith.constant 0 : index
    %17 = vector.load %arg6[%c0_14, %c0_15] : memref<1x128xf32, #tpu.memory_space<vmem>>, vector<1x128xf32>
    %18 = vector.broadcast %17 : vector<1x128xf32> to vector<128x128xf32>
    %19 = arith.addf %16, %18 : vector<128x128xf32>
    %20 = arith.truncf %19 : vector<128x128xf32> to vector<128x128xbf16>
    %c0_16 = arith.constant 0 : index
    %c0_17 = arith.constant 0 : index
    %21 = vector.load %arg7[%c0_16, %c0_17] : memref<128x128xbf16, #tpu.memory_space<vmem>>, vector<128x128xbf16>
    %cst_18 = arith.constant dense<0.000000e+00> : vector<128x128xf32>
    %22 = tpu.matmul %20, %21, %cst_18 {dimension_numbers = #tpu.dot_dimension_numbers<[1], [0], [0], [1], [0, 0, 1, 1], [], []>} : vector<128x128xbf16>, vector<128x128xbf16>, vector<128x128xf32> -> vector<128x128xf32>
    %cst_19 = arith.constant dense<0.000000e+00> : vector<128x128xf32>
    %23 = tpu.matmul %0, %20, %cst_19 {dimension_numbers = #tpu.dot_dimension_numbers<[1], [0], [0], [1], [0, 0, 1, 1], [], []>} : vector<128x128xbf16>, vector<128x128xbf16>, vector<128x128xf32> -> vector<128x128xf32>
    %24 = arith.truncf %23 : vector<128x128xf32> to vector<128x128xbf16>
    %c0_20 = arith.constant 0 : index
    %c0_21 = arith.constant 0 : index
    %25 = vector.load %arg8[%c0_20, %c0_21] : memref<128x128xbf16, #tpu.memory_space<vmem>>, vector<128x128xbf16>
    %cst_22 = arith.constant dense<0.000000e+00> : vector<128x128xf32>
    %26 = tpu.matmul %24, %25, %cst_22 {dimension_numbers = #tpu.dot_dimension_numbers<[1], [0], [0], [1], [0, 0, 1, 1], [], []>} : vector<128x128xbf16>, vector<128x128xbf16>, vector<128x128xf32> -> vector<128x128xf32>
    %27 = arith.addf %22, %26 : vector<128x128xf32>
    %c0_23 = arith.constant 0 : index
    %c0_24 = arith.constant 0 : index
    %28 = vector.load %arg9[%c0_23, %c0_24] : memref<1x128xf32, #tpu.memory_space<vmem>>, vector<1x128xf32>
    %29 = vector.broadcast %28 : vector<1x128xf32> to vector<128x128xf32>
    %30 = arith.addf %27, %29 : vector<128x128xf32>
    %cst_25 = arith.constant 0.000000e+00 : f32
    %31 = vector.broadcast %cst_25 : f32 to vector<128x128xf32>
    %32 = arith.maximumf %30, %31 : vector<128x128xf32>
    %33 = arith.truncf %32 : vector<128x128xf32> to vector<128x128xbf16>
    %c0_26 = arith.constant 0 : index
    %c0_27 = arith.constant 0 : index
    %34 = vector.load %arg10[%c0_26, %c0_27] : memref<128x128xbf16, #tpu.memory_space<vmem>>, vector<128x128xbf16>
    %cst_28 = arith.constant dense<0.000000e+00> : vector<128x128xf32>
    %35 = tpu.matmul %33, %34, %cst_28 {dimension_numbers = #tpu.dot_dimension_numbers<[1], [0], [0], [1], [0, 0, 1, 1], [], []>} : vector<128x128xbf16>, vector<128x128xbf16>, vector<128x128xf32> -> vector<128x128xf32>
    %cst_29 = arith.constant dense<0.000000e+00> : vector<128x128xf32>
    %36 = tpu.matmul %0, %33, %cst_29 {dimension_numbers = #tpu.dot_dimension_numbers<[1], [0], [0], [1], [0, 0, 1, 1], [], []>} : vector<128x128xbf16>, vector<128x128xbf16>, vector<128x128xf32> -> vector<128x128xf32>
    %37 = arith.truncf %36 : vector<128x128xf32> to vector<128x128xbf16>
    %c0_30 = arith.constant 0 : index
    %c0_31 = arith.constant 0 : index
    %38 = vector.load %arg11[%c0_30, %c0_31] : memref<128x128xbf16, #tpu.memory_space<vmem>>, vector<128x128xbf16>
    %cst_32 = arith.constant dense<0.000000e+00> : vector<128x128xf32>
    %39 = tpu.matmul %37, %38, %cst_32 {dimension_numbers = #tpu.dot_dimension_numbers<[1], [0], [0], [1], [0, 0, 1, 1], [], []>} : vector<128x128xbf16>, vector<128x128xbf16>, vector<128x128xf32> -> vector<128x128xf32>
    %40 = arith.addf %35, %39 : vector<128x128xf32>
    %c0_33 = arith.constant 0 : index
    %c0_34 = arith.constant 0 : index
    %41 = vector.load %arg12[%c0_33, %c0_34] : memref<1x128xf32, #tpu.memory_space<vmem>>, vector<1x128xf32>
    %42 = vector.broadcast %41 : vector<1x128xf32> to vector<128x128xf32>
    %43 = arith.addf %40, %42 : vector<128x128xf32>
    %c0_35 = arith.constant 0 : index
    %c0_36 = arith.constant 0 : index
    %44 = vector.load %arg13[%c0_35, %c0_36] : memref<128x128xf32, #tpu.memory_space<vmem>>, vector<128x128xf32>
    tpu.vector_store %arg13[%c0_35, %c0_36], %43 {strides = array<i32>} : memref<128x128xf32, #tpu.memory_space<vmem>>, vector<128x128xf32>,
    return
  }
}

</mosaic_0001>

<bundles_post_ra>
// kernel: model_forward.1
= control target key start
LH: loop header
LB: loop body
LE: loop exit
PB: predicated region body
PF: predicated region fallthrough
CT: control target
= control target key end

     0   :  { %18 = vsyncpa [#allocation3], 0  ;;  %s2346_s0 = inlined_call_operand.hbm [shape: bf16[128,128], index: 0, kind: input, shape index: {}]   ;;  %s2347_s1 = inlined_call_operand.hbm [shape: bf16[128,128], index: 1, kind: input, shape index: {}]   ;;  %s2348_s2 = inlined_call_operand.hbm [shape: bf16[128,128], index: 2, kind: input, shape index: {}]   ;;  %s2349_s3 = inlined_call_operand.hbm [shape: bf16[128,128], index: 3, kind: input, shape index: {}]   ;;  %s2350_s4 = inlined_call_operand.vmem [shape: f32[1,128], index: 4, kind: input, shape index: {}]   ;;  %s2351_s5 = inlined_call_operand.vmem [shape: f32[1,128], index: 5, kind: input, shape index: {}]   ;;  %s2352_s6 = inlined_call_operand.vmem [shape: f32[1,128], index: 6, kind: input, shape index: {}]   ;;  %s2353_s7 = inlined_call_operand.hbm [shape: bf16[128,128], index: 7, kind: input, shape index: {}]   ;;  %s2354_s8 = inlined_call_operand.hbm [shape: bf16[128,128], index: 8, kind: input, shape index: {}]   ;;  %s2355_s9 = inlined_call_operand.hbm [shape: f32[1,128], index: 9, kind: input, shape index: {}]   ;;  %s2356_s10 = inlined_call_operand.hbm [shape: bf16[128,128], index: 10, kind: input, shape index: {}]   ;;  %s2357_s11 = inlined_call_operand.hbm [shape: bf16[128,128], index: 11, kind: input, shape index: {}]   ;;  %s2358_s12 = inlined_call_operand.hbm [shape: f32[1,128], index: 12, kind: input, shape index: {}]   ;;  %s2359_s13 = inlined_call_operand.vmem [shape: f32[128,128], index: 13, kind: output, shape index: {}]  }
   0x1   :  { %19 = vsyncpa [#allocation5], 0 }
   0x2   :  { %20 = vsyncpa [#allocation8], 0 }
   0x3   :  { %21 = vsyncpa [#allocation11], 0 }
   0x4   :  { %22 = vsyncpa [#allocation14], 0 }
   0x5   :  { %23 = vsyncpa [#allocation17], 0  ;;  %s41_s27 = sshll.u32 %s2347_s1, 4  ;;  %s1960_s28 = smov [#allocation4]   ;;  %s42_s27 = int_to_ptr.hbm [resolvable:$true] %s41_s27 }
   0x6   :  { %s43_s29 = sshll.u32 %s1960_s28, 4  ;;  %s67_s15 = sshll.u32 %s2349_s3, 4  ;;  %s44_s29 = int_to_ptr.vmem [resolvable:$true] %s43_s29  ;;  %s68_s15 = int_to_ptr.hbm [resolvable:$true] %s67_s15 }
   0x7   :  { %s1961_s16 = smov 64   ;;  %s1962_s17 = smov 4  }
   0x8   :  { %49 = dma.hbm_to_vmem [thread:$0]  %s42_s27, 1024, %s44_s29, [#allocation5], %s1961_s16, %s1961_s16, %s1962_s17  }
   0x9   :  { %s1963_s18 = smov [#allocation7]   ;;  %s99_s1 = sshll.u32 %s2354_s8, 4  ;;  %s100_s1 = int_to_ptr.hbm [resolvable:$true] %s99_s1 }
   0xa   :  { %s69_s19 = sshll.u32 %s1963_s18, 4  ;;  %s123_s23 = sshll.u32 %s2356_s10, 4  ;;  %s70_s19 = int_to_ptr.vmem [resolvable:$true] %s69_s19  ;;  %s124_s23 = int_to_ptr.hbm [resolvable:$true] %s123_s23 }
   0xb   :  { %75 = dma.hbm_to_vmem [thread:$0]  %s68_s15, 1024, %s70_s19, [#allocation8], %s1961_s16, %s1961_s16, %s1962_s17  }
   0xc   :  { %s1964_s24 = smov [#allocation10]   ;;  %s1965_s26 = smov [#allocation13]  }
   0xd   :  { %s101_s25 = sshll.u32 %s1964_s24, 4  ;;  %s125_s8 = sshll.u32 %s1965_s26, 4  ;;  %s102_s25 = int_to_ptr.vmem [resolvable:$true] %s101_s25  ;;  %s126_s8 = int_to_ptr.vmem [resolvable:$true] %s125_s8 }
   0xe   :  { %107 = dma.hbm_to_vmem [thread:$0]  %s100_s1, 1024, %s102_s25, [#allocation11], %s1961_s16, %s1961_s16, %s1962_s17  }
   0xf   :  { %s28_s29 = sshll.u32 %s2346_s0, 4  ;;  %s54_s14 = sshll.u32 %s2348_s2, 4  ;;  %s29_s29 = int_to_ptr.hbm [resolvable:$true] %s28_s29  ;;  %s55_s14 = int_to_ptr.hbm [resolvable:$true] %s54_s14 }
  0x10   :  { %131 = dma.hbm_to_vmem [thread:$0]  %s124_s23, 1024, %s126_s8, [#allocation14], %s1961_s16, %s1961_s16, %s1962_s17  }
  0x11   :  { %s1966_s15 = smov [#allocation2]   ;;  %s1967_s19 = smov [#allocation6]  }
  0x12   :  { %s30_s18 = sshll.u32 %s1966_s15, 4  ;;  %s56_s0 = sshll.u32 %s1967_s19, 4  ;;  %s31_s18 = int_to_ptr.vmem [resolvable:$true] %s30_s18  ;;  %s57_s0 = int_to_ptr.vmem [resolvable:$true] %s56_s0 }
  0x13   :  { %36 = dma.hbm_to_vmem [thread:$0]  %s29_s29, 1024, %s31_s18, [#allocation3], %s1961_s16, %s1961_s16, %s1962_s17  }
  0x14   :  { %s86_s1 = sshll.u32 %s2353_s7, 4  ;;  %s113_s22 = sshll.u32 %s2355_s9, 4  ;;  %s87_s1 = int_to_ptr.hbm [resolvable:$true] %s86_s1  ;;  %s114_s22 = int_to_ptr.hbm [resolvable:$true] %s113_s22 }
  0x15   :  { %62 = dma.hbm_to_vmem [thread:$0]  %s55_s14, 1024, %s57_s0, [#allocation5], %s1961_s16, %s1961_s16, %s1962_s17  }
  0x16   :  { %s1968_s23 = smov [#allocation9]   ;;  %s1969_s25 = smov [#allocation12]  }
  0x17   :  { %s88_s24 = sshll.u32 %s1968_s23, 4  ;;  %s115_s7 = sshll.u32 %s1969_s25, 4  ;;  %s89_s24 = int_to_ptr.vmem [resolvable:$true] %s88_s24  ;;  %s116_s7 = int_to_ptr.vmem [resolvable:$true] %s115_s7 }
  0x18   :  { %94 = dma.hbm_to_vmem [thread:$0]  %s87_s1, 1024, %s89_s24, [#allocation8], %s1961_s16, %s1961_s16, %s1962_s17  }
  0x19   :  { %s136_s27 = sshll.u32 %s2357_s11, 4  ;;  %s150_s9 = sshll.u32 %s2358_s12, 4  ;;  %s137_s27 = int_to_ptr.hbm [resolvable:$true] %s136_s27  ;;  %s151_s9 = int_to_ptr.hbm [resolvable:$true] %s150_s9 }
  0x1a   :  { %118 = dma.hbm_to_vmem [thread:$0]  %s114_s22, 16, %s116_s7, [#allocation11]  }
  0x1b   :  { %s1970_s10 = smov [#allocation15]   ;;  %s1971_s14 = smov [#allocation16]  }
  0x1c   :  { %s138_s30 = sshll.u32 %s1970_s10, 4  ;;  %s152_s15 = sshll.u32 %s1971_s14, 4  ;;  %s139_s30 = int_to_ptr.vmem [resolvable:$true] %s138_s30  ;;  %s153_s15 = int_to_ptr.vmem [resolvable:$true] %s152_s15 }
  0x1d   :  { %144 = dma.hbm_to_vmem [thread:$0]  %s137_s27, 1024, %s139_s30, [#allocation14], %s1961_s16, %s1961_s16, %s1962_s17  }
  0x1e   :  { %155 = dma.hbm_to_vmem [thread:$0]  %s151_s9, 16, %s153_s15, [#allocation17]  }
  0x1f   :  { %1948 = dma.done.wait [#allocation3], 1024  }
  0x20   :  { %1949 = vsyncadd [#allocation3], 4294966272 }
  0x21   :  { %1950 = dma.done.wait [#allocation5], 2048  }
  0x22   :  { %1951 = vsyncadd [#allocation5], 4294965248 }
  0x23   :  { %1952 = dma.done.wait [#allocation8], 2048  }
  0x24   :  { %1953 = vsyncadd [#allocation8], 4294965248 }
  0x25   :  { %1954 = dma.done.wait [#allocation11], 1040  }
  0x26   :  { %1955 = vsyncadd [#allocation11], 4294966256 }
  0x27   :  { %1956 = dma.done.wait [#allocation14], 2048  }
  0x28   :  { %1957 = vsyncadd [#allocation14], 4294965248 }
  0x29   :  { %1958 = dma.done.wait [#allocation17], 16  }
  0x2a   :  { %1959 = vsyncadd [#allocation17], 4294967280  ;;  %v2096_v0 = vld [vmem:[#allocation4 + $0x38] sm:$0xff]  ;;  %v2099_v1 = vld [vmem:[#allocation4 + $0x30] sm:$0xff] }
  0x2b   :  { %340 = vmatpush.bf16.msra.mxu0 %v2096_v0  ;;  %1667 = vmatpush.bf16.msra.mxu1 %v2096_v0  ;;  %v2105_v2 = vld [vmem:[#allocation4 + $0x28] sm:$0xff]  ;;  %v2111_v3 = vld [vmem:[#allocation4 + $0x20] sm:$0xff]  ;;  %v2117_v4 = vld [vmem:[#allocation4 + $0x18] sm:$0xff] }
  0x2c   :  { %1668 = vmatpush.bf16.msra.mxu2 %v2096_v0  ;;  %1669 = vmatpush.bf16.msra.mxu3 %v2096_v0  ;;  %v1613_v5 = vld [vmem:[#allocation4 + $0x10] sm:$0xff]  ;;  %v1612_v6 = vld [vmem:[#allocation4 + $0x8] sm:$0xff]  ;;  %v1611_v7 = vld [vmem:[#allocation4] sm:$0xff] }
  0x2d   :  { %v1626_v8 = vld [vmem:[#allocation6 + $0x38] sm:$0xff]  ;;  %v2126_v10 = vld [vmem:[#allocation2] sm:$0xff]  ;;  %v2128_v11 = vld [vmem:[#allocation2 + $0x10] sm:$0xff] }
  0x2e   :  { %v1634_v9 = vld [vmem:[#allocation7 + $0x38] sm:$0xff]  ;;  %v2130_v12 = vld [vmem:[#allocation2 + $0x20] sm:$0xff]  ;;  %v2132_v13 = vld [vmem:[#allocation2 + $0x30] sm:$0xff] }
  0x2f   :  { %341 = vmatpush.bf16.msra.mxu0 %v2099_v1  ;;  %1670 = vmatpush.bf16.msra.mxu1 %v2099_v1  ;;  %v1625_v14 = vld [vmem:[#allocation6 + $0x30] sm:$0xff]  ;;  %v1624_v16 = vld [vmem:[#allocation6 + $0x28] sm:$0xff]  ;;  %v1623_v18 = vld [vmem:[#allocation6 + $0x20] sm:$0xff] }
  0x30   :  { %1671 = vmatpush.bf16.msra.mxu2 %v2099_v1  ;;  %1672 = vmatpush.bf16.msra.mxu3 %v2099_v1  ;;  %v1633_v15 = vld [vmem:[#allocation7 + $0x30] sm:$0xff]  ;;  %v1632_v17 = vld [vmem:[#allocation7 + $0x28] sm:$0xff]  ;;  %v1631_v19 = vld [vmem:[#allocation7 + $0x20] sm:$0xff] }
  0x31   :  { %v1622_v20 = vld [vmem:[#allocation6 + $0x18] sm:$0xff]  ;;  %v2138_v22 = vld [vmem:[#allocation2 + $0x8] sm:$0xff]  ;;  %v1621_v26 = vld [vmem:[#allocation6 + $0x10] sm:$0xff] }
  0x32   :  { %v1630_v21 = vld [vmem:[#allocation7 + $0x18] sm:$0xff]  ;;  %v2142_v24 = vld [vmem:[#allocation2 + $0x28] sm:$0xff]  ;;  %v1619_v28 = vld [vmem:[#allocation6] sm:$0xff] }
  0x33   :  { %342 = vmatpush.bf16.msra.mxu0 %v2105_v2  ;;  %1673 = vmatpush.bf16.msra.mxu1 %v2105_v2  ;;  %v2140_v23 = vld [vmem:[#allocation2 + $0x18] sm:$0xff]  ;;  %v1620_v27 = vld [vmem:[#allocation6 + $0x8] sm:$0xff]  ;;  %v1629_v29 = vld [vmem:[#allocation7 + $0x10] sm:$0xff] }
  0x34   :  { %1674 = vmatpush.bf16.msra.mxu2 %v2105_v2  ;;  %1675 = vmatpush.bf16.msra.mxu3 %v2105_v2  ;;  %v2144_v25 = vld [vmem:[#allocation2 + $0x38] sm:$0xff]  ;;  %v1628_v30 = vld [vmem:[#allocation7 + $0x8] sm:$0xff]  ;;  %v1627_v31 = vld [vmem:[#allocation7] sm:$0xff] }
  0x35   :  { %v1642_v51 = vld [vmem:[#allocation9 + $0x38] sm:$0xff]  ;;  %v1641_v52 = vld [vmem:[#allocation9 + $0x30] sm:$0xff]  ;;  %v1640_v53 = vld [vmem:[#allocation9 + $0x28] sm:$0xff] }
  0x36   :  { %v1639_v55 = vld [vmem:[#allocation9 + $0x20] sm:$0xff]  ;;  %v1638_v59 = vld [vmem:[#allocation9 + $0x18] sm:$0xff]  ;;  %v1637_v60 = vld [vmem:[#allocation9 + $0x10] sm:$0xff] }
  0x37   :  { %343 = vmatpush.bf16.msra.mxu0 %v2111_v3  ;;  %1676 = vmatpush.bf16.msra.mxu1 %v2111_v3  ;;  %v1636_v62 = vld [vmem:[#allocation9 + $0x8] sm:$0xff] }
  0x38   :  { %1677 = vmatpush.bf16.msra.mxu2 %v2111_v3  ;;  %1678 = vmatpush.bf16.msra.mxu3 %v2111_v3 }
  0x3b   :  { %344 = vmatpush.bf16.msra.mxu0 %v2117_v4  ;;  %1679 = vmatpush.bf16.msra.mxu1 %v2117_v4 }
  0x3c   :  { %1680 = vmatpush.bf16.msra.mxu2 %v2117_v4  ;;  %1681 = vmatpush.bf16.msra.mxu3 %v2117_v4 }
  0x3f   :  { %345 = vmatpush.bf16.msra.mxu0 %v1613_v5  ;;  %1682 = vmatpush.bf16.msra.mxu1 %v1613_v5 }
  0x40   :  { %1683 = vmatpush.bf16.msra.mxu2 %v1613_v5  ;;  %1684 = vmatpush.bf16.msra.mxu3 %v1613_v5 }
  0x43   :  { %346 = vmatpush.bf16.msra.mxu0 %v1612_v6  ;;  %1685 = vmatpush.bf16.msra.mxu1 %v1612_v6 }
  0x44   :  { %1686 = vmatpush.bf16.msra.mxu2 %v1612_v6  ;;  %1687 = vmatpush.bf16.msra.mxu3 %v1612_v6 }
  0x47   :  { %347 = vmatpush.bf16.msra.mxu0 %v1611_v7  ;;  %1688 = vmatpush.bf16.msra.mxu1 %v1611_v7 }
  0x48   :  { %1689 = vmatpush.bf16.msra.mxu2 %v1611_v7  ;;  %1690 = vmatpush.bf16.msra.mxu3 %v1611_v7 }
  0x4a   :  { %348 = vmatmul.bf16.vlgmr.msra.gmra.mxu0 %v2126_v10  ;;  %358 = vmatmul.bf16.vlgmr.msra.gmra.mxu1 %v2128_v11 }
  0x4b   :  { %461 = vmatpush.bf16.msrb.mxu1 %v1634_v9  ;;  %368 = vmatmul.bf16.vlgmr.msra.gmra.mxu2 %v2130_v12 }
  0x4c   :  { %558 = vmatpush.bf16.msrb.mxu2 %v1626_v8  ;;  %378 = vmatmul.bf16.vlgmr.msra.gmra.mxu3 %v2132_v13 }
  0x4f   :  { %462 = vmatpush.bf16.msrb.mxu1 %v1633_v15 }
  0x50   :  { %559 = vmatpush.bf16.msrb.mxu2 %v1625_v14  ;;  %v2164_v14 = vld [vmem:[%s2351_s5] ss:$0 sm:$0xff] }
  0x53   :  { %463 = vmatpush.bf16.msrb.mxu1 %v1632_v17 }
  0x54   :  { %560 = vmatpush.bf16.msrb.mxu2 %v1624_v16 }
  0x57   :  { %464 = vmatpush.bf16.msrb.mxu1 %v1631_v19  ;;  %v2171_v19 = vld [vmem:[%s2352_s6] ss:$0 sm:$0xff] }
  0x58   :  { %561 = vmatpush.bf16.msrb.mxu2 %v1623_v18 }
  0x5a   :  { %353 = vmatmul.bf16.gmra.mxu0 %v2138_v22  ;;  %363 = vmatmul.bf16.gmra.mxu1 %v2140_v23 }
  0x5b   :  { %465 = vmatpush.bf16.msrb.mxu1 %v1630_v21  ;;  %373 = vmatmul.bf16.gmra.mxu2 %v2142_v24 }
  0x5c   :  { %562 = vmatpush.bf16.msrb.mxu2 %v1622_v20  ;;  %383 = vmatmul.bf16.gmra.mxu3 %v2144_v25 }
  0x5f   :  { %466 = vmatpush.bf16.msrb.mxu1 %v1629_v29 }
  0x60   :  { %563 = vmatpush.bf16.msrb.mxu2 %v1621_v26 }
  0x63   :  { %467 = vmatpush.bf16.msrb.mxu1 %v1628_v30 }
  0x64   :  { %564 = vmatpush.bf16.msrb.mxu2 %v1620_v27 }
  0x67   :  { %468 = vmatpush.bf16.msrb.mxu1 %v1627_v31 }
  0x68   :  { %565 = vmatpush.bf16.msrb.mxu2 %v1619_v28 }
  0x6b   :  { %566 = vmatmul.bf16.vlgmr.msrb.gmra.mxu2 %v1611_v7  ;;  %925 = vmatpush.bf16.msra.mxu1 %v1642_v51 }
  0x6f   :  { %926 = vmatpush.bf16.msra.mxu1 %v1641_v52 }
  0x73   :  { %927 = vmatpush.bf16.msra.mxu1 %v1640_v53 }
  0x77   :  { %928 = vmatpush.bf16.msra.mxu1 %v1639_v55 }
  0x7b   :  { %571 = vmatmul.bf16.gmra.mxu2 %v1612_v6  ;;  %929 = vmatpush.bf16.msra.mxu1 %v1638_v59  ;;  %v2158_v6 = vld [vmem:[%s2350_s4] ss:$0 sm:$0xff] }
  0x7f   :  { %930 = vmatpush.bf16.msra.mxu1 %v1637_v60 }
  0x83   :  { %931 = vmatpush.bf16.msra.mxu1 %v1636_v62 }
  0x8b   :  { %576 = vmatmul.bf16.gmra.mxu2 %v1613_v5 }
  0x9b   :  { %581 = vmatmul.bf16.gmra.mxu2 %v2117_v4 }
  0xab   :  { %586 = vmatmul.bf16.gmra.mxu2 %v2111_v3 }
  0xbb   :  { %591 = vmatmul.bf16.gmra.mxu2 %v2105_v2 }
  0xc7   :  { %v349_v32 = vpop.f32.mrf.mxu0  ;;  %v359_v37 = vpop.f32.mrf.mxu1 }
  0xcb   :  { %596 = vmatmul.bf16.gmra.mxu2 %v2099_v1 }
  0xce   :  { %v369_v43 = vpop.f32.mrf.mxu2 }
  0xcf   :  { %v351_v33 = vpop.f32.mrf.mxu0  ;;  %v361_v39 = vpop.f32.mrf.mxu1 }
  0xd0   :  { %v389_v34 = vpack.c.bf16 %v351_v33, %v349_v32  ;;  %v391_v40 = vpack.c.bf16 %v361_v39, %v359_v37  ;;  %v379_v49 = vpop.f32.mrf.mxu3 }
  0xd2   :  { %469 = vmatmul.bf16.vlgmr.msrb.gmra.mxu1 %v389_v34 }
  0xd6   :  { %v371_v45 = vpop.f32.mrf.mxu2 }
  0xd7   :  { %v354_v35 = vpop.f32.mrf.mxu0  ;;  %v364_v41 = vpop.f32.mrf.mxu1  ;;  %v393_v46 = vpack.c.bf16 %v371_v45, %v369_v43 }
  0xd8   :  { %v381_v54 = vpop.f32.mrf.mxu3 }
  0xd9   :  { %v395_v56 = vpack.c.bf16 %v381_v54, %v379_v49 }
  0xdb   :  { %601 = vmatmul.bf16.gmra.mxu2 %v2096_v0  ;;  %v1635_v0 = vld [vmem:[#allocation9] sm:$0xff] }
  0xdc   :  { %932 = vmatpush.bf16.msra.mxu1 %v1635_v0 }
  0xde   :  { %v374_v47 = vpop.f32.mrf.mxu2 }
  0xdf   :  { %v356_v36 = vpop.f32.mrf.mxu0  ;;  %v366_v42 = vpop.f32.mrf.mxu1 }
  0xe0   :  { %v390_v38 = vpack.c.bf16 %v356_v36, %v354_v35  ;;  %v392_v44 = vpack.c.bf16 %v366_v42, %v364_v41  ;;  %v384_v58 = vpop.f32.mrf.mxu3 }
  0xe2   :  { %474 = vmatmul.bf16.gmra.mxu1 %v390_v38 }
  0xe6   :  { %v376_v48 = vpop.f32.mrf.mxu2 }
  0xe7   :  { %v394_v50 = vpack.c.bf16 %v376_v48, %v374_v47 }
  0xe8   :  { %v386_v63 = vpop.f32.mrf.mxu3 }
  0xe9   :  { %v396_v1 = vpack.c.bf16 %v386_v63, %v384_v58 }
  0xee   :  { %v567_v57 = vpop.f32.mrf.mxu2 }
  0xf2   :  { %479 = vmatmul.bf16.gmra.mxu1 %v391_v40 }
  0xf6   :  { %v569_v61 = vpop.f32.mrf.mxu2 }
  0xfe   :  { %v572_v2 = vpop.f32.mrf.mxu2 }
 0x102   :  { %484 = vmatmul.bf16.gmra.mxu1 %v392_v44 }
 0x106   :  { %v574_v4 = vpop.f32.mrf.mxu2 }
 0x10e   :  { %v577_v16 = vpop.f32.mrf.mxu2 }
 0x112   :  { %489 = vmatmul.bf16.gmra.mxu1 %v393_v46 }
 0x116   :  { %v579_v31 = vpop.f32.mrf.mxu2 }
 0x11e   :  { %v582_v39 = vpop.f32.mrf.mxu2 }
 0x122   :  { %494 = vmatmul.bf16.gmra.mxu1 %v394_v50 }
 0x126   :  { %v584_v48 = vpop.f32.mrf.mxu2 }
 0x12e   :  { %v587_v59 = vpop.f32.mrf.mxu2 }
 0x132   :  { %499 = vmatmul.bf16.gmra.mxu1 %v395_v56 }
 0x142   :  { %504 = vmatmul.bf16.gmra.mxu1 %v396_v1 }
 0x14f   :  { %v470_v3 = vpop.f32.mrf.mxu1 }
 0x150   :  { %v568_v5 = vadd.f32 %v567_v57, %v470_v3 }
 0x152   :  { %v611_v7 = vadd.f32 %v2158_v6, %v568_v5 }
 0x154   :  { %v627_v9 = vmax.f32 %v611_v7, 0.0 }
 0x156   :  { %v647_v18 = vmul.f32 %v2164_v14, %v627_v9 }
 0x157   :  { %v472_v8 = vpop.f32.mrf.mxu1 }
 0x158   :  { %v570_v15 = vadd.f32 %v569_v61, %v472_v8  ;;  %v667_v27 = vadd.f32 %v2171_v19, %v647_v18 }
 0x15a   :  { %v612_v17 = vadd.f32 %v2158_v6, %v570_v15 }
 0x15c   :  { %v628_v20 = vmax.f32 %v612_v17, 0.0 }
 0x15e   :  { %v648_v21 = vmul.f32 %v2164_v14, %v628_v20 }
 0x15f   :  { %v475_v26 = vpop.f32.mrf.mxu1 }
 0x160   :  { %v668_v28 = vadd.f32 %v2171_v19, %v648_v21  ;;  %v573_v29 = vadd.f32 %v572_v2, %v475_v26  ;;  %v589_v2 = vpop.f32.mrf.mxu2 }
 0x162   :  { %v2176_v30 = vpack.c.bf16 %v668_v28, %v667_v27  ;;  %v613_v32 = vadd.f32 %v2158_v6, %v573_v29 }
 0x164   :  { %933 = vmatmul.bf16.vlgmr.msra.gmra.mxu1 %v2176_v30  ;;  %v629_v34 = vmax.f32 %v613_v32, 0.0 }
 0x166   :  { %v649_v37 = vmul.f32 %v2164_v14, %v629_v34 }
 0x167   :  { %v477_v33 = vpop.f32.mrf.mxu1 }
 0x168   :  { %v575_v35 = vadd.f32 %v574_v4, %v477_v33  ;;  %v669_v43 = vadd.f32 %v2171_v19, %v649_v37  ;;  %v592_v18 = vpop.f32.mrf.mxu2 }
 0x16a   :  { %v614_v36 = vadd.f32 %v2158_v6, %v575_v35 }
 0x16c   :  { %v630_v38 = vmax.f32 %v614_v36, 0.0 }
 0x16e   :  { %v650_v40 = vmul.f32 %v2164_v14, %v630_v38 }
 0x16f   :  { %v480_v41 = vpop.f32.mrf.mxu1 }
 0x170   :  { %v578_v42 = vadd.f32 %v577_v16, %v480_v41  ;;  %v670_v44 = vadd.f32 %v2171_v19, %v650_v40  ;;  %v594_v33 = vpop.f32.mrf.mxu2 }
 0x172   :  { %v2185_v45 = vpack.c.bf16 %v670_v44, %v669_v43  ;;  %v615_v46 = vadd.f32 %v2158_v6, %v578_v42 }
 0x174   :  { %938 = vmatmul.bf16.gmra.mxu1 %v2185_v45  ;;  %v631_v49 = vmax.f32 %v615_v46, 0.0 }
 0x176   :  { %v651_v52 = vmul.f32 %v2164_v14, %v631_v49 }
 0x177   :  { %v482_v47 = vpop.f32.mrf.mxu1 }
 0x178   :  { %v580_v50 = vadd.f32 %v579_v31, %v482_v47  ;;  %v671_v57 = vadd.f32 %v2171_v19, %v651_v52  ;;  %v597_v42 = vpop.f32.mrf.mxu2 }
 0x17a   :  { %v616_v51 = vadd.f32 %v2158_v6, %v580_v50 }
 0x17c   :  { %v632_v53 = vmax.f32 %v616_v51, 0.0 }
 0x17e   :  { %v652_v54 = vmul.f32 %v2164_v14, %v632_v53 }
 0x17f   :  { %v485_v55 = vpop.f32.mrf.mxu1 }
 0x180   :  { %v583_v56 = vadd.f32 %v582_v39, %v485_v55  ;;  %v672_v58 = vadd.f32 %v2171_v19, %v652_v54  ;;  %v599_v53 = vpop.f32.mrf.mxu2 }
 0x182   :  { %v2194_v60 = vpack.c.bf16 %v672_v58, %v671_v57  ;;  %v617_v61 = vadd.f32 %v2158_v6, %v583_v56 }
 0x184   :  { %943 = vmatmul.bf16.gmra.mxu1 %v2194_v60  ;;  %v633_v63 = vmax.f32 %v617_v61, 0.0 }
 0x186   :  { %v653_v3 = vmul.f32 %v2164_v14, %v633_v63 }
 0x187   :  { %v487_v62 = vpop.f32.mrf.mxu1 }
 0x188   :  { %v585_v0 = vadd.f32 %v584_v48, %v487_v62  ;;  %v673_v9 = vadd.f32 %v2171_v19, %v653_v3  ;;  %v602_v62 = vpop.f32.mrf.mxu2 }
 0x18a   :  { %v618_v1 = vadd.f32 %v2158_v6, %v585_v0 }
 0x18c   :  { %v634_v4 = vmax.f32 %v618_v1, 0.0 }
 0x18e   :  { %v654_v5 = vmul.f32 %v2164_v14, %v634_v4 }
 0x18f   :  { %v490_v7 = vpop.f32.mrf.mxu1 }
 0x190   :  { %v588_v8 = vadd.f32 %v587_v59, %v490_v7  ;;  %v674_v15 = vadd.f32 %v2171_v19, %v654_v5  ;;  %v604_v7 = vpop.f32.mrf.mxu2 }
 0x192   :  { %v2203_v16 = vpack.c.bf16 %v674_v15, %v673_v9  ;;  %v619_v17 = vadd.f32 %v2158_v6, %v588_v8 }
 0x194   :  { %948 = vmatmul.bf16.gmra.mxu1 %v2203_v16  ;;  %v635_v21 = vmax.f32 %v619_v17, 0.0 }
 0x196   :  { %v655_v28 = vmul.f32 %v2164_v14, %v635_v21 }
 0x197   :  { %v492_v20 = vpop.f32.mrf.mxu1 }
 0x198   :  { %v590_v26 = vadd.f32 %v589_v2, %v492_v20  ;;  %v675_v35 = vadd.f32 %v2171_v19, %v655_v28 }
 0x19a   :  { %v620_v27 = vadd.f32 %v2158_v6, %v590_v26 }
 0x19c   :  { %v636_v29 = vmax.f32 %v620_v27, 0.0 }
 0x19e   :  { %v656_v31 = vmul.f32 %v2164_v14, %v636_v29  ;;  %v1643_v29 = vld [vmem:[#allocation10] sm:$0xff] }
 0x19f   :  { %v495_v32 = vpop.f32.mrf.mxu1 }
 0x1a0   :  { %v593_v34 = vadd.f32 %v592_v18, %v495_v32  ;;  %v676_v36 = vadd.f32 %v2171_v19, %v656_v31 }
 0x1a2   :  { %v687_v37 = vpack.c.bf16 %v676_v36, %v675_v35  ;;  %v621_v38 = vadd.f32 %v2158_v6, %v593_v34 }
 0x1a4   :  { %953 = vmatmul.bf16.gmra.mxu1 %v687_v37  ;;  %v637_v40 = vmax.f32 %v621_v38, 0.0 }
 0x1a6   :  { %v657_v44 = vmul.f32 %v2164_v14, %v637_v40 }
 0x1a7   :  { %v497_v39 = vpop.f32.mrf.mxu1 }
 0x1a8   :  { %v595_v41 = vadd.f32 %v594_v33, %v497_v39  ;;  %v677_v50 = vadd.f32 %v2171_v19, %v657_v44 }
 0x1aa   :  { %v622_v43 = vadd.f32 %v2158_v6, %v595_v41 }
 0x1ac   :  { %v638_v46 = vmax.f32 %v622_v43, 0.0 }
 0x1ae   :  { %v658_v47 = vmul.f32 %v2164_v14, %v638_v46 }
 0x1af   :  { %v500_v48 = vpop.f32.mrf.mxu1 }
 0x1b0   :  { %v598_v49 = vadd.f32 %v597_v42, %v500_v48  ;;  %v678_v51 = vadd.f32 %v2171_v19, %v658_v47 }
 0x1b2   :  { %v688_v52 = vpack.c.bf16 %v678_v51, %v677_v50  ;;  %v623_v54 = vadd.f32 %v2158_v6, %v598_v49  ;;  %v1658_v49 = vld [vmem:[#allocation13 + $0x38] sm:$0xff]  ;;  %v1657_v51 = vld [vmem:[#allocation13 + $0x30] sm:$0xff] }
 0x1b4   :  { %958 = vmatmul.bf16.gmra.mxu1 %v688_v52  ;;  %v639_v56 = vmax.f32 %v623_v54, 0.0  ;;  %v1655_v54 = vld [vmem:[#allocation13 + $0x20] sm:$0xff] }
 0x1b6   :  { %v659_v59 = vmul.f32 %v2164_v14, %v639_v56  ;;  %v1654_v56 = vld [vmem:[#allocation13 + $0x18] sm:$0xff] }
 0x1b7   :  { %v502_v55 = vpop.f32.mrf.mxu1 }
 0x1b8   :  { %v600_v57 = vadd.f32 %v599_v53, %v502_v55  ;;  %v679_v2 = vadd.f32 %v2171_v19, %v659_v59  ;;  %v1653_v59 = vld [vmem:[#allocation13 + $0x10] sm:$0xff] }
 0x1ba   :  { %v624_v58 = vadd.f32 %v2158_v6, %v600_v57 }
 0x1bc   :  { %v640_v61 = vmax.f32 %v624_v58, 0.0 }
 0x1be   :  { %v660_v63 = vmul.f32 %v2164_v14, %v640_v61 }
 0x1bf   :  { %v505_v0 = vpop.f32.mrf.mxu1 }
 0x1c0   :  { %v603_v1 = vadd.f32 %v602_v62, %v505_v0  ;;  %v680_v3 = vadd.f32 %v2171_v19, %v660_v63  ;;  %v1652_v62 = vld [vmem:[#allocation13 + $0x8] sm:$0xff]  ;;  %v1651_v0 = vld [vmem:[#allocation13] sm:$0xff] }
 0x1c2   :  { %v689_v4 = vpack.c.bf16 %v680_v3, %v679_v2  ;;  %v625_v5 = vadd.f32 %v2158_v6, %v603_v1 }
 0x1c4   :  { %963 = vmatmul.bf16.gmra.mxu1 %v689_v4  ;;  %v641_v9 = vmax.f32 %v625_v5, 0.0 }
 0x1c6   :  { %v661_v18 = vmul.f32 %v2164_v14, %v641_v9 }
 0x1c7   :  { %v507_v8 = vpop.f32.mrf.mxu1 }
 0x1c8   :  { %v605_v15 = vadd.f32 %v604_v7, %v507_v8  ;;  %v681_v26 = vadd.f32 %v2171_v19, %v661_v18  ;;  %v2242_v8 = vld [vmem:[#allocation12] ss:$0 sm:$0xff] }
 0x1ca   :  { %v626_v17 = vadd.f32 %v2158_v6, %v605_v15  ;;  %v1650_v6 = vld [vmem:[#allocation10 + $0x38] sm:$0xff] }
 0x1cb   :  { %828 = vmatpush.bf16.msrb.mxu0 %v1650_v6 }
 0x1cc   :  { %v642_v20 = vmax.f32 %v626_v17, 0.0 }
 0x1ce   :  { %v662_v21 = vmul.f32 %v2164_v14, %v642_v20  ;;  %v1649_v14 = vld [vmem:[#allocation10 + $0x30] sm:$0xff] }
 0x1cf   :  { %829 = vmatpush.bf16.msrb.mxu0 %v1649_v14 }
 0x1d0   :  { %v682_v27 = vadd.f32 %v2171_v19, %v662_v21  ;;  %v1648_v19 = vld [vmem:[#allocation10 + $0x28] sm:$0xff] }
 0x1d2   :  { %v690_v28 = vpack.c.bf16 %v682_v27, %v681_v26 }
 0x1d3   :  { %830 = vmatpush.bf16.msrb.mxu0 %v1648_v19 }
 0x1d4   :  { %707 = vmatpush.bf16.msrb.mxu3 %v690_v28  ;;  %968 = vmatmul.bf16.gmra.mxu1 %v690_v28 }
 0x1d8   :  { %708 = vmatpush.bf16.msrb.mxu3 %v689_v4 }
 0x1dc   :  { %709 = vmatpush.bf16.msrb.mxu3 %v688_v52  ;;  %v1656_v52 = vld [vmem:[#allocation13 + $0x28] sm:$0xff] }
 0x1e0   :  { %710 = vmatpush.bf16.msrb.mxu3 %v687_v37 }
 0x1e1   :  { %v934_v58 = vpop.f32.mrf.mxu1 }
 0x1e4   :  { %711 = vmatpush.bf16.msrb.mxu3 %v2203_v16  ;;  %v1644_v16 = vld [vmem:[#allocation10 + $0x8] sm:$0xff] }
 0x1e8   :  { %712 = vmatpush.bf16.msrb.mxu3 %v2194_v60  ;;  %v1645_v60 = vld [vmem:[#allocation10 + $0x10] sm:$0xff] }
 0x1e9   :  { %v936_v63 = vpop.f32.mrf.mxu1 }
 0x1ec   :  { %713 = vmatpush.bf16.msrb.mxu3 %v2185_v45  ;;  %v1647_v45 = vld [vmem:[#allocation10 + $0x20] sm:$0xff] }
 0x1ed   :  { %831 = vmatpush.bf16.msrb.mxu0 %v1647_v45 }
 0x1f0   :  { %714 = vmatpush.bf16.msrb.mxu3 %v2176_v30  ;;  %v1646_v30 = vld [vmem:[#allocation10 + $0x18] sm:$0xff] }
 0x1f1   :  { %832 = vmatpush.bf16.msrb.mxu0 %v1646_v30  ;;  %v939_v3 = vpop.f32.mrf.mxu1 }
 0x1f3   :  { %715 = vmatmul.bf16.vlgmr.msrb.gmra.mxu3 %v2126_v10 }
 0x1f5   :  { %833 = vmatpush.bf16.msrb.mxu0 %v1645_v60 }
 0x1f9   :  { %834 = vmatpush.bf16.msrb.mxu0 %v1644_v16  ;;  %v941_v4 = vpop.f32.mrf.mxu1 }
 0x1fd   :  { %835 = vmatpush.bf16.msrb.mxu0 %v1643_v29 }
 0x201   :  { %1252 = vmatpush.bf16.msra.mxu0 %v1658_v49  ;;  %v944_v18 = vpop.f32.mrf.mxu1 }
 0x203   :  { %720 = vmatmul.bf16.gmra.mxu3 %v2138_v22 }
 0x205   :  { %1253 = vmatpush.bf16.msra.mxu0 %v1657_v51 }
 0x209   :  { %1254 = vmatpush.bf16.msra.mxu0 %v1656_v52  ;;  %v946_v6 = vpop.f32.mrf.mxu1 }
 0x20d   :  { %1255 = vmatpush.bf16.msra.mxu0 %v1655_v54 }
 0x211   :  { %1256 = vmatpush.bf16.msra.mxu0 %v1654_v56 }
 0x213   :  { %725 = vmatmul.bf16.gmra.mxu3 %v2128_v11 }
 0x215   :  { %1257 = vmatpush.bf16.msra.mxu0 %v1653_v59 }
 0x219   :  { %1258 = vmatpush.bf16.msra.mxu0 %v1652_v62 }
 0x21d   :  { %1259 = vmatpush.bf16.msra.mxu0 %v1651_v0 }
 0x223   :  { %730 = vmatmul.bf16.gmra.mxu3 %v2140_v23 }
 0x233   :  { %735 = vmatmul.bf16.gmra.mxu3 %v2130_v12 }
 0x243   :  { %740 = vmatmul.bf16.gmra.mxu3 %v2142_v24 }
 0x253   :  { %745 = vmatmul.bf16.gmra.mxu3 %v2132_v13 }
 0x263   :  { %750 = vmatmul.bf16.gmra.mxu3 %v2144_v25 }
 0x276   :  { %v716_v31 = vpop.f32.mrf.mxu3 }
 0x27e   :  { %v718_v32 = vpop.f32.mrf.mxu3 }
 0x27f   :  { %v756_v33 = vpack.c.bf16 %v718_v32, %v716_v31  ;;  %v949_v31 = vpop.f32.mrf.mxu1 }
 0x281   :  { %836 = vmatmul.bf16.vlgmr.msrb.gmra.mxu0 %v756_v33 }
 0x286   :  { %v721_v34 = vpop.f32.mrf.mxu3 }
 0x28e   :  { %v723_v35 = vpop.f32.mrf.mxu3 }
 0x28f   :  { %v757_v36 = vpack.c.bf16 %v723_v35, %v721_v34  ;;  %v951_v35 = vpop.f32.mrf.mxu1 }
 0x291   :  { %841 = vmatmul.bf16.gmra.mxu0 %v757_v36 }
 0x296   :  { %v726_v37 = vpop.f32.mrf.mxu3 }
 0x29e   :  { %v728_v38 = vpop.f32.mrf.mxu3 }
 0x29f   :  { %v758_v39 = vpack.c.bf16 %v728_v38, %v726_v37 }
 0x2a1   :  { %846 = vmatmul.bf16.gmra.mxu0 %v758_v39 }
 0x2a6   :  { %v731_v40 = vpop.f32.mrf.mxu3 }
 0x2ae   :  { %v733_v41 = vpop.f32.mrf.mxu3 }
 0x2af   :  { %v759_v42 = vpack.c.bf16 %v733_v41, %v731_v40 }
 0x2b1   :  { %851 = vmatmul.bf16.gmra.mxu0 %v759_v42 }
 0x2b6   :  { %v736_v43 = vpop.f32.mrf.mxu3 }
 0x2be   :  { %v738_v44 = vpop.f32.mrf.mxu3 }
 0x2bf   :  { %v760_v46 = vpack.c.bf16 %v738_v44, %v736_v43  ;;  %v954_v44 = vpop.f32.mrf.mxu1 }
 0x2c1   :  { %856 = vmatmul.bf16.gmra.mxu0 %v760_v46 }
 0x2c6   :  { %v741_v47 = vpop.f32.mrf.mxu3 }
 0x2c7   :  { %v956_v51 = vpop.f32.mrf.mxu1 }
 0x2ce   :  { %v743_v48 = vpop.f32.mrf.mxu3 }
 0x2cf   :  { %v761_v50 = vpack.c.bf16 %v743_v48, %v741_v47 }
 0x2d1   :  { %861 = vmatmul.bf16.gmra.mxu0 %v761_v50 }
 0x2d6   :  { %v746_v53 = vpop.f32.mrf.mxu3 }
 0x2de   :  { %v748_v55 = vpop.f32.mrf.mxu3 }
 0x2df   :  { %v762_v57 = vpack.c.bf16 %v748_v55, %v746_v53 }
 0x2e1   :  { %866 = vmatmul.bf16.gmra.mxu0 %v762_v57  ;;  %v959_v57 = vpop.f32.mrf.mxu1 }
 0x2e6   :  { %v751_v61 = vpop.f32.mrf.mxu3 }
 0x2ee   :  { %v753_v1 = vpop.f32.mrf.mxu3 }
 0x2ef   :  { %v763_v2 = vpack.c.bf16 %v753_v1, %v751_v61 }
 0x2f1   :  { %871 = vmatmul.bf16.gmra.mxu0 %v763_v2  ;;  %v961_v2 = vpop.f32.mrf.mxu1 }
 0x2fe   :  { %v837_v5 = vpop.f32.mrf.mxu0 }
 0x2ff   :  { %v935_v7 = vadd.f32 %v934_v58, %v837_v5 }
 0x301   :  { %v978_v15 = vadd.f32 %v2242_v8, %v935_v7 }
 0x303   :  { %v994_v21 = vmax.f32 %v978_v15, 0.0  ;;  %v964_v15 = vpop.f32.mrf.mxu1 }
 0x306   :  { %v839_v9 = vpop.f32.mrf.mxu0 }
 0x307   :  { %v937_v17 = vadd.f32 %v936_v63, %v839_v9 }
 0x309   :  { %v979_v20 = vadd.f32 %v2242_v8, %v937_v17 }
 0x30b   :  { %v995_v26 = vmax.f32 %v979_v20, 0.0 }
 0x30d   :  { %v2246_v27 = vpack.c.bf16 %v995_v26, %v994_v21 }
 0x30e   :  { %v842_v28 = vpop.f32.mrf.mxu0 }
 0x30f   :  { %1260 = vmatmul.bf16.vlgmr.msra.gmra.mxu0 %v2246_v27  ;;  %v940_v14 = vadd.f32 %v939_v3, %v842_v28  ;;  %v966_v28 = vpop.f32.mrf.mxu1 }
 0x311   :  { %v980_v45 = vadd.f32 %v2242_v8, %v940_v14 }
 0x313   :  { %v996_v16 = vmax.f32 %v980_v45, 0.0 }
 0x316   :  { %v844_v19 = vpop.f32.mrf.mxu0 }
 0x317   :  { %v942_v30 = vadd.f32 %v941_v4, %v844_v19 }
 0x319   :  { %v981_v60 = vadd.f32 %v2242_v8, %v942_v30 }
 0x31b   :  { %v997_v29 = vmax.f32 %v981_v60, 0.0 }
 0x31d   :  { %v2251_v32 = vpack.c.bf16 %v997_v29, %v996_v16  ;;  %v969_v29 = vpop.f32.mrf.mxu1 }
 0x31e   :  { %v847_v33 = vpop.f32.mrf.mxu0 }
 0x31f   :  { %1265 = vmatmul.bf16.gmra.mxu0 %v2251_v32  ;;  %v945_v34 = vadd.f32 %v944_v18, %v847_v33 }
 0x321   :  { %v982_v37 = vadd.f32 %v2242_v8, %v945_v34 }
 0x323   :  { %v998_v40 = vmax.f32 %v982_v37, 0.0 }
 0x326   :  { %v849_v36 = vpop.f32.mrf.mxu0 }
 0x327   :  { %v947_v38 = vadd.f32 %v946_v6, %v849_v36 }
 0x329   :  { %v983_v39 = vadd.f32 %v2242_v8, %v947_v38 }
 0x32b   :  { %v999_v41 = vmax.f32 %v983_v39, 0.0 }
 0x32d   :  { %v2256_v42 = vpack.c.bf16 %v999_v41, %v998_v40 }
 0x32e   :  { %v852_v43 = vpop.f32.mrf.mxu0 }
 0x32f   :  { %1270 = vmatmul.bf16.gmra.mxu0 %v2256_v42  ;;  %v950_v46 = vadd.f32 %v949_v31, %v852_v43 }
 0x331   :  { %v984_v48 = vadd.f32 %v2242_v8, %v950_v46 }
 0x333   :  { %v1000_v52 = vmax.f32 %v984_v48, 0.0 }
 0x336   :  { %v854_v47 = vpop.f32.mrf.mxu0 }
 0x337   :  { %v952_v49 = vadd.f32 %v951_v35, %v854_v47  ;;  %v971_v35 = vpop.f32.mrf.mxu1 }
 0x339   :  { %v985_v50 = vadd.f32 %v2242_v8, %v952_v49 }
 0x33b   :  { %v1001_v53 = vmax.f32 %v985_v50, 0.0 }
 0x33d   :  { %v1013_v54 = vpack.c.bf16 %v1001_v53, %v1000_v52 }
 0x33e   :  { %v857_v55 = vpop.f32.mrf.mxu0 }
 0x33f   :  { %1275 = vmatmul.bf16.gmra.mxu0 %v1013_v54  ;;  %v955_v56 = vadd.f32 %v954_v44, %v857_v55  ;;  %v1665_v44 = vld [vmem:[#allocation15 + $0x30] sm:$0xff] }
 0x341   :  { %v986_v59 = vadd.f32 %v2242_v8, %v955_v56 }
 0x343   :  { %v1002_v63 = vmax.f32 %v986_v59, 0.0 }
 0x346   :  { %v859_v58 = vpop.f32.mrf.mxu0 }
 0x347   :  { %v957_v61 = vadd.f32 %v956_v51, %v859_v58 }
 0x349   :  { %v987_v62 = vadd.f32 %v2242_v8, %v957_v61 }
 0x34b   :  { %v1003_v0 = vmax.f32 %v987_v62, 0.0 }
 0x34d   :  { %v1014_v1 = vpack.c.bf16 %v1003_v0, %v1002_v63 }
 0x34e   :  { %v862_v3 = vpop.f32.mrf.mxu0 }
 0x34f   :  { %1280 = vmatmul.bf16.gmra.mxu0 %v1014_v1  ;;  %v960_v4 = vadd.f32 %v959_v57, %v862_v3 }
 0x351   :  { %v988_v7 = vadd.f32 %v2242_v8, %v960_v4 }
 0x353   :  { %v1004_v18 = vmax.f32 %v988_v7, 0.0 }
 0x356   :  { %v864_v5 = vpop.f32.mrf.mxu0 }
 0x357   :  { %v962_v9 = vadd.f32 %v961_v2, %v864_v5  ;;  %v2280_v5 = vld [vmem:[#allocation16] ss:$0 sm:$0xff] }
 0x359   :  { %v989_v17 = vadd.f32 %v2242_v8, %v962_v9 }
 0x35b   :  { %v1005_v20 = vmax.f32 %v989_v17, 0.0 }
 0x35d   :  { %v1015_v21 = vpack.c.bf16 %v1005_v20, %v1004_v18 }
 0x35e   :  { %v867_v26 = vpop.f32.mrf.mxu0 }
 0x35f   :  { %1285 = vmatmul.bf16.gmra.mxu0 %v1015_v21  ;;  %v965_v6 = vadd.f32 %v964_v15, %v867_v26 }
 0x361   :  { %v990_v19 = vadd.f32 %v2242_v8, %v965_v6 }
 0x363   :  { %v1006_v60 = vmax.f32 %v990_v19, 0.0 }
 0x366   :  { %v869_v14 = vpop.f32.mrf.mxu0 }
 0x367   :  { %v967_v45 = vadd.f32 %v966_v28, %v869_v14 }
 0x369   :  { %v991_v30 = vadd.f32 %v2242_v8, %v967_v45 }
 0x36b   :  { %v1007_v16 = vmax.f32 %v991_v30, 0.0 }
 0x36d   :  { %v1016_v31 = vpack.c.bf16 %v1007_v16, %v1006_v60 }
 0x36e   :  { %v872_v33 = vpop.f32.mrf.mxu0 }
 0x36f   :  { %1290 = vmatmul.bf16.gmra.mxu0 %v1016_v31  ;;  %v970_v34 = vadd.f32 %v969_v29, %v872_v33 }
 0x371   :  { %v992_v37 = vadd.f32 %v2242_v8, %v970_v34 }
 0x373   :  { %v1008_v40 = vmax.f32 %v992_v37, 0.0 }
 0x376   :  { %v874_v36 = vpop.f32.mrf.mxu0 }
 0x377   :  { %v972_v38 = vadd.f32 %v971_v35, %v874_v36 }
 0x379   :  { %v993_v39 = vadd.f32 %v2242_v8, %v972_v38  ;;  %v1666_v8 = vld [vmem:[#allocation15 + $0x38] sm:$0xff] }
 0x37a   :  { %1155 = vmatpush.bf16.msra.mxu3 %v1666_v8 }
 0x37b   :  { %v1009_v41 = vmax.f32 %v993_v39, 0.0 }
 0x37d   :  { %v1017_v43 = vpack.c.bf16 %v1009_v41, %v1008_v40 }
 0x37e   :  { %1156 = vmatpush.bf16.msra.mxu3 %v1665_v44 }
 0x37f   :  { %1034 = vmatpush.bf16.msra.mxu2 %v1017_v43  ;;  %1295 = vmatmul.bf16.gmra.mxu0 %v1017_v43 }
 0x383   :  { %1035 = vmatpush.bf16.msra.mxu2 %v1016_v31 }
 0x387   :  { %1036 = vmatpush.bf16.msra.mxu2 %v1015_v21 }
 0x38b   :  { %1037 = vmatpush.bf16.msra.mxu2 %v1014_v1 }
 0x38c   :  { %v1261_v63 = vpop.f32.mrf.mxu0 }
 0x38f   :  { %1038 = vmatpush.bf16.msra.mxu2 %v1013_v54 }
 0x393   :  { %1039 = vmatpush.bf16.msra.mxu2 %v2256_v42  ;;  %v1664_v42 = vld [vmem:[#allocation15 + $0x28] sm:$0xff] }
 0x394   :  { %1157 = vmatpush.bf16.msra.mxu3 %v1664_v42  ;;  %v1263_v3 = vpop.f32.mrf.mxu0 }
 0x397   :  { %1040 = vmatpush.bf16.msra.mxu2 %v2251_v32  ;;  %v1663_v32 = vld [vmem:[#allocation15 + $0x20] sm:$0xff] }
 0x398   :  { %1158 = vmatpush.bf16.msra.mxu3 %v1663_v32 }
 0x39b   :  { %1041 = vmatpush.bf16.msra.mxu2 %v2246_v27  ;;  %v1662_v27 = vld [vmem:[#allocation15 + $0x18] sm:$0xff] }
 0x39c   :  { %1159 = vmatpush.bf16.msra.mxu3 %v1662_v27  ;;  %v1266_v4 = vpop.f32.mrf.mxu0 }
 0x39e   :  { %1042 = vmatmul.bf16.vlgmr.msra.gmra.mxu2 %v2126_v10  ;;  %v1661_v10 = vld [vmem:[#allocation15 + $0x10] sm:$0xff] }
 0x3a0   :  { %1160 = vmatpush.bf16.msra.mxu3 %v1661_v10 }
 0x3a4   :  { %v1268_v7 = vpop.f32.mrf.mxu0 }
 0x3ac   :  { %v1271_v21 = vpop.f32.mrf.mxu0 }
 0x3ae   :  { %1047 = vmatmul.bf16.gmra.mxu2 %v2138_v22  ;;  %v1659_v22 = vld [vmem:[#allocation15] sm:$0xff] }
 0x3b4   :  { %v1273_v19 = vpop.f32.mrf.mxu0 }
 0x3bc   :  { %v1276_v16 = vpop.f32.mrf.mxu0 }
 0x3be   :  { %1052 = vmatmul.bf16.gmra.mxu2 %v2128_v11  ;;  %v1660_v11 = vld [vmem:[#allocation15 + $0x8] sm:$0xff] }
 0x3bf   :  { %1161 = vmatpush.bf16.msra.mxu3 %v1660_v11 }
 0x3c3   :  { %1162 = vmatpush.bf16.msra.mxu3 %v1659_v22 }
 0x3c4   :  { %v1278_v34 = vpop.f32.mrf.mxu0 }
 0x3cc   :  { %v1281_v40 = vpop.f32.mrf.mxu0 }
 0x3ce   :  { %1057 = vmatmul.bf16.gmra.mxu2 %v2140_v23 }
 0x3d4   :  { %v1283_v42 = vpop.f32.mrf.mxu0 }
 0x3dc   :  { %v1286_v11 = vpop.f32.mrf.mxu0 }
 0x3de   :  { %1062 = vmatmul.bf16.gmra.mxu2 %v2130_v12 }
 0x3ee   :  { %1067 = vmatmul.bf16.gmra.mxu2 %v2142_v24 }
 0x3fe   :  { %1072 = vmatmul.bf16.gmra.mxu2 %v2132_v13 }
 0x40e   :  { %1077 = vmatmul.bf16.gmra.mxu2 %v2144_v25 }
 0x421   :  { %v1043_v12 = vpop.f32.mrf.mxu2 }
 0x429   :  { %v1045_v23 = vpop.f32.mrf.mxu2 }
 0x42a   :  { %v1083_v24 = vpack.c.bf16 %v1045_v23, %v1043_v12 }
 0x42c   :  { %1163 = vmatmul.bf16.vlgmr.msra.gmra.mxu3 %v1083_v24  ;;  %v1288_v24 = vpop.f32.mrf.mxu0 }
 0x431   :  { %v1048_v46 = vpop.f32.mrf.mxu2 }
 0x439   :  { %v1050_v47 = vpop.f32.mrf.mxu2 }
 0x43a   :  { %v1084_v48 = vpack.c.bf16 %v1050_v47, %v1048_v46 }
 0x43c   :  { %1168 = vmatmul.bf16.gmra.mxu3 %v1084_v48 }
 0x441   :  { %v1053_v49 = vpop.f32.mrf.mxu2 }
 0x449   :  { %v1055_v50 = vpop.f32.mrf.mxu2 }
 0x44a   :  { %v1085_v51 = vpack.c.bf16 %v1055_v50, %v1053_v49 }
 0x44c   :  { %1173 = vmatmul.bf16.gmra.mxu3 %v1085_v51  ;;  %v1291_v51 = vpop.f32.mrf.mxu0 }
 0x451   :  { %v1058_v13 = vpop.f32.mrf.mxu2 }
 0x459   :  { %v1060_v52 = vpop.f32.mrf.mxu2 }
 0x45a   :  { %v1086_v53 = vpack.c.bf16 %v1060_v52, %v1058_v13 }
 0x45c   :  { %1178 = vmatmul.bf16.gmra.mxu3 %v1086_v53 }
 0x461   :  { %v1063_v54 = vpop.f32.mrf.mxu2 }
 0x469   :  { %v1065_v55 = vpop.f32.mrf.mxu2 }
 0x46a   :  { %v1087_v56 = vpack.c.bf16 %v1065_v55, %v1063_v54  ;;  %v1293_v55 = vpop.f32.mrf.mxu0 }
 0x46c   :  { %1183 = vmatmul.bf16.gmra.mxu3 %v1087_v56 }
 0x471   :  { %v1068_v25 = vpop.f32.mrf.mxu2 }
 0x479   :  { %v1070_v57 = vpop.f32.mrf.mxu2 }
 0x47a   :  { %v1088_v58 = vpack.c.bf16 %v1070_v57, %v1068_v25 }
 0x47c   :  { %1188 = vmatmul.bf16.gmra.mxu3 %v1088_v58  ;;  %v1296_v58 = vpop.f32.mrf.mxu0 }
 0x481   :  { %v1073_v59 = vpop.f32.mrf.mxu2 }
 0x489   :  { %v1075_v61 = vpop.f32.mrf.mxu2 }
 0x48a   :  { %v1089_v62 = vpack.c.bf16 %v1075_v61, %v1073_v59 }
 0x48c   :  { %1193 = vmatmul.bf16.gmra.mxu3 %v1089_v62 }
 0x491   :  { %v1078_v0 = vpop.f32.mrf.mxu2 }
 0x499   :  { %v1080_v1 = vpop.f32.mrf.mxu2 }
 0x49a   :  { %v1090_v2 = vpack.c.bf16 %v1080_v1, %v1078_v0 }
 0x49c   :  { %1198 = vmatmul.bf16.gmra.mxu3 %v1090_v2 }
 0x4af   :  { %v1164_v9 = vpop.f32.mrf.mxu3 }
 0x4b0   :  { %v1262_v15 = vadd.f32 %v1261_v63, %v1164_v9  ;;  %v1298_v63 = vpop.f32.mrf.mxu0 }
 0x4b2   :  { %v1305_v17 = vadd.f32 %v2280_v5, %v1262_v15 }
 0x4b4   :  { %1321 = vst [vmem:[%s2359_s13] sm:$0xff] %v1305_v17 }
 0x4b7   :  { %v1166_v18 = vpop.f32.mrf.mxu3 }
 0x4b8   :  { %v1264_v20 = vadd.f32 %v1263_v3, %v1166_v18 }
 0x4ba   :  { %v1306_v26 = vadd.f32 %v2280_v5, %v1264_v20 }
 0x4bc   :  { %1322 = vst [vmem:[%s2359_s13 + $0x8] sm:$0xff] %v1306_v26 }
 0x4bf   :  { %v1169_v28 = vpop.f32.mrf.mxu3 }
 0x4c0   :  { %v1267_v6 = vadd.f32 %v1266_v4, %v1169_v28 }
 0x4c2   :  { %v1307_v14 = vadd.f32 %v2280_v5, %v1267_v6 }
 0x4c4   :  { %1323 = vst [vmem:[%s2359_s13 + $0x10] sm:$0xff] %v1307_v14 }
 0x4c7   :  { %v1171_v45 = vpop.f32.mrf.mxu3 }
 0x4c8   :  { %v1269_v30 = vadd.f32 %v1268_v7, %v1171_v45 }
 0x4ca   :  { %v1308_v60 = vadd.f32 %v2280_v5, %v1269_v30 }
 0x4cc   :  { %1324 = vst [vmem:[%s2359_s13 + $0x18] sm:$0xff] %v1308_v60 }
 0x4cf   :  { %v1174_v29 = vpop.f32.mrf.mxu3 }
 0x4d0   :  { %v1272_v31 = vadd.f32 %v1271_v21, %v1174_v29 }
 0x4d2   :  { %v1309_v33 = vadd.f32 %v2280_v5, %v1272_v31 }
 0x4d4   :  { %1325 = vst [vmem:[%s2359_s13 + $0x20] sm:$0xff] %v1309_v33 }
 0x4d7   :  { %v1176_v35 = vpop.f32.mrf.mxu3 }
 0x4d8   :  { %v1274_v36 = vadd.f32 %v1273_v19, %v1176_v35 }
 0x4da   :  { %v1310_v37 = vadd.f32 %v2280_v5, %v1274_v36 }
 0x4dc   :  { %1326 = vst [vmem:[%s2359_s13 + $0x28] sm:$0xff] %v1310_v37 }
 0x4df   :  { %v1179_v38 = vpop.f32.mrf.mxu3 }
 0x4e0   :  { %v1277_v39 = vadd.f32 %v1276_v16, %v1179_v38 }
 0x4e2   :  { %v1311_v41 = vadd.f32 %v2280_v5, %v1277_v39 }
 0x4e4   :  { %1327 = vst [vmem:[%s2359_s13 + $0x30] sm:$0xff] %v1311_v41 }
 0x4e7   :  { %v1181_v43 = vpop.f32.mrf.mxu3 }
 0x4e8   :  { %v1279_v8 = vadd.f32 %v1278_v34, %v1181_v43 }
 0x4ea   :  { %v1312_v44 = vadd.f32 %v2280_v5, %v1279_v8 }
 0x4ec   :  { %1328 = vst [vmem:[%s2359_s13 + $0x38] sm:$0xff] %v1312_v44 }
 0x4ef   :  { %v1184_v32 = vpop.f32.mrf.mxu3 }
 0x4f0   :  { %v1282_v27 = vadd.f32 %v1281_v40, %v1184_v32 }
 0x4f2   :  { %v1313_v10 = vadd.f32 %v2280_v5, %v1282_v27 }
 0x4f4   :  { %1329 = vst [vmem:[%s2359_s13 + $0x40] sm:$0xff] %v1313_v10 }
 0x4f7   :  { %v1186_v22 = vpop.f32.mrf.mxu3 }
 0x4f8   :  { %v1284_v12 = vadd.f32 %v1283_v42, %v1186_v22 }
 0x4fa   :  { %v1314_v23 = vadd.f32 %v2280_v5, %v1284_v12 }
 0x4fc   :  { %1330 = vst [vmem:[%s2359_s13 + $0x48] sm:$0xff] %v1314_v23 }
 0x4ff   :  { %v1189_v46 = vpop.f32.mrf.mxu3 }
 0x500   :  { %v1287_v47 = vadd.f32 %v1286_v11, %v1189_v46 }
 0x502   :  { %v1315_v48 = vadd.f32 %v2280_v5, %v1287_v47 }
 0x504   :  { %1331 = vst [vmem:[%s2359_s13 + $0x50] sm:$0xff] %v1315_v48 }
 0x507   :  { %v1191_v49 = vpop.f32.mrf.mxu3 }
 0x508   :  { %v1289_v50 = vadd.f32 %v1288_v24, %v1191_v49 }
 0x50a   :  { %v1316_v13 = vadd.f32 %v2280_v5, %v1289_v50 }
 0x50c   :  { %1332 = vst [vmem:[%s2359_s13 + $0x58] sm:$0xff] %v1316_v13 }
 0x50f   :  { %v1194_v52 = vpop.f32.mrf.mxu3 }
 0x510   :  { %v1292_v53 = vadd.f32 %v1291_v51, %v1194_v52 }
 0x512   :  { %v1317_v54 = vadd.f32 %v2280_v5, %v1292_v53 }
 0x514   :  { %1333 = vst [vmem:[%s2359_s13 + $0x60] sm:$0xff] %v1317_v54 }
 0x517   :  { %v1196_v56 = vpop.f32.mrf.mxu3 }
 0x518   :  { %v1294_v25 = vadd.f32 %v1293_v55, %v1196_v56 }
 0x51a   :  { %v1318_v57 = vadd.f32 %v2280_v5, %v1294_v25 }
 0x51c   :  { %1334 = vst [vmem:[%s2359_s13 + $0x68] sm:$0xff] %v1318_v57 }
 0x51f   :  { %v1199_v59 = vpop.f32.mrf.mxu3 }
 0x520   :  { %v1297_v61 = vadd.f32 %v1296_v58, %v1199_v59 }
 0x522   :  { %v1319_v62 = vadd.f32 %v2280_v5, %v1297_v61 }
 0x524   :  { %1335 = vst [vmem:[%s2359_s13 + $0x70] sm:$0xff] %v1319_v62 }
 0x527   :  { %v1201_v0 = vpop.f32.mrf.mxu3 }
 0x528   :  { %v1299_v1 = vadd.f32 %v1298_v63, %v1201_v0 }
 0x52a   :  { %v1320_v2 = vadd.f32 %v2280_v5, %v1299_v1 }
 0x52c   :  { %1336 = vst [vmem:[%s2359_s13 + $0x78] sm:$0xff] %v1320_v2 }
 0x52d   :  { %1341 = vsyncpa [#allocation3], 1 }
 0x52e   :  { %1342 = vsyncpa [#allocation5], 1 }
 0x52f   :  { %1343 = vsyncpa [#allocation8], 1 }
 0x530   :  { %1344 = vsyncpa [#allocation11], 1 }
 0x531   :  { %1345 = vsyncpa [#allocation14], 1 }
 0x532   :  { %1346 = vsyncpa [#allocation17], 1 }

</bundles_post_ra>
